<compile_context>
chip_gen: v7x
topology: tpu7x:2x2x1
jax: 0.10.0
libtpu: 0.0.40
codegen_flags: <defaults>
</compile_context>

<pallas_src>
import jax
import jax.numpy as jnp
from jax.experimental import pallas as pl
from jax.experimental.pallas import tpu as pltpu

LN_EPS = 1e-5  # PyTorch nn.LayerNorm default


def _round_up(n, m):
    return ((n + m - 1) // m) * m


def _min_sublanes(dtype):
    # Minimum second-minor tile multiple per dtype (sub-32-bit packs along sublanes).
    itemsize = jnp.dtype(dtype).itemsize
    return {4: 8, 2: 16, 1: 32}.get(itemsize, 8)


def sublayer_kernel(x_ref, w_ref, p_ref, o_ref):
    # x_ref: (TM, D) row tile; w_ref: (D, D); p_ref: (3, D) = [bias; gamma; beta] (f32).
    x = x_ref[...]

    # Linear(d_model, d_model): MXU-native operands (optionally bf16), f32 accumulation.
    y = jnp.dot(x.astype(w_ref.dtype), w_ref[...], preferred_element_type=jnp.float32)

    bias = p_ref[0:1, :]
    gamma = p_ref[1:2, :]
    beta = p_ref[2:3, :]

    # dropout (inference mode) is identity.
    # TODO(synk): training-mode dropout would need pltpu.prng_seed/prng_random_bits.

    # Residual add (+ linear bias), in f32 on the VPU.
    r = x.astype(jnp.float32) + y + bias

    # Two-pass LayerNorm statistics (biased variance, like torch.nn.LayerNorm);
    # avoids the E[r^2]-E[r]^2 cancellation of the one-pass form.
    d_inv = 1.0 / r.shape[-1]
    mean = jnp.sum(r, axis=-1, keepdims=True) * d_inv
    c = r - mean
    var = jnp.sum(c * c, axis=-1, keepdims=True) * d_inv
    inv = jax.lax.rsqrt(var + LN_EPS)

    o_ref[...] = (c * inv * gamma + beta).astype(o_ref.dtype)


def sublayer_forward(x, w, b, gamma, beta, *, tm=None, mxu_bf16=False):
    """x: (batch, seq, d_model). Returns same shape/dtype."""
    batch, seq, d = x.shape
    rows = batch * seq
    x2 = x.reshape(rows, d)

    sub = _min_sublanes(x.dtype)
    xb = jnp.dtype(x.dtype).itemsize

    # Optional bf16 feeding of the MXU for f32 inputs (f32 accumulation preserved).
    mxu_dtype = jnp.bfloat16 if (mxu_bf16 and x.dtype == jnp.float32) else x.dtype
    w_in = w.astype(mxu_dtype)
    wb = jnp.dtype(w_in.dtype).itemsize

    # Per-generation VMEM budget (v5e/v6e: 128 MiB, v7x: 64 MiB). Conservative fallback.
    try:
        vmem_cap = int(pltpu.get_tpu_info().vmem_capacity_bytes)
    except Exception:
        vmem_cap = 64 * 1024 * 1024
    budget = int(0.70 * vmem_cap)

    # Fixed VMEM residents: W (single-buffered) + fused params (single-buffered).
    fixed = d * d * wb + 3 * d * 4
    # Per-row VMEM: x tile (double-buffered) + out tile (double-buffered)
    # + ~3 f32 temporaries (y, r/c, out) inside the kernel body.
    per_row = d * (2 * xb + 2 * xb + 3 * 4)

    if tm is None:
        # Target ~2 MiB x tiles to amortize the ~0.35us fixed per-grid-step overhead.
        tm = max(sub, (2 * 1024 * 1024) // (d * xb))
    tm = _round_up(max(tm, sub), sub)

    # Clamp by the VMEM budget (degrades gracefully to `sub` for huge d; see K-tiling TODO).
    tm_cap = max(sub, ((budget - fixed) // max(per_row, 1)) // sub * sub)
    tm = min(tm, tm_cap)

    # Keep at least 2 grid steps when possible so the "parallel" row axis can be
    # sharded across both TensorCores on v7x.
    if rows > sub and pl.cdiv(rows, tm) < 2:
        tm = _round_up(pl.cdiv(rows, 2), sub)
    tm = min(tm, _round_up(rows, sub))

    grid = (pl.cdiv(rows, tm),)

    # Fuse bias/gamma/beta into one (3, D) f32 operand: one DMA stream instead of three.
    params = jnp.stack(
        [b.astype(jnp.float32), gamma.astype(jnp.float32), beta.astype(jnp.float32)],
        axis=0,
    )

    est_usage = fixed + tm * per_row
    vmem_limit = int(min(0.85 * vmem_cap, max(32 * 1024 * 1024, 2 * est_usage)))

    cost = pl.CostEstimate(
        flops=2 * rows * d * d + 10 * rows * d,
        transcendentals=rows,  # one rsqrt per row
        bytes_accessed=2 * rows * d * xb + d * d * wb + 3 * d * 4,
    )

    out = pl.pallas_call(
        sublayer_kernel,
        out_shape=jax.ShapeDtypeStruct((rows, d), x.dtype),
        grid_spec=pltpu.PrefetchScalarGridSpec(
            num_scalar_prefetch=0,
            grid=grid,
            in_specs=[
                # streamed row tile of x (default double-buffered)
                pl.BlockSpec((tm, d), lambda i: (i, 0)),
                # grid-invariant W: single copy in VMEM
                pl.BlockSpec((d, d), lambda i: (0, 0), pipeline_mode=pl.Buffered(1)),
                # grid-invariant [bias; gamma; beta]: single copy in VMEM
                pl.BlockSpec((3, d), lambda i: (0, 0), pipeline_mode=pl.Buffered(1)),
            ],
            out_specs=pl.BlockSpec((tm, d), lambda i: (i, 0)),
        ),
        compiler_params=pltpu.CompilerParams(
            dimension_semantics=("parallel",),  # shard the row axis across TCs on v7x
            vmem_limit_bytes=vmem_limit,
        ),
        cost_estimate=cost,
    )(x2, w_in, params)

    return out.reshape(batch, seq, d)


def _reference(x, w, b, gamma, beta):
    lin = x @ w + b
    r = x + lin
    mu = r.mean(-1, keepdims=True)
    var = ((r - mu) ** 2).mean(-1, keepdims=True)
    return (r - mu) / jnp.sqrt(var + LN_EPS) * gamma + beta


if __name__ == "__main__":
    d_model = 128

    key = jax.random.PRNGKey(0)
    kx, kw, kb, kx2 = jax.random.split(key, 4)

    # deterministic parameter init (synthetic; not a checkpoint load)
    w = jax.random.normal(kw, (d_model, d_model), dtype=jnp.float32) * 0.02
    b = jax.random.normal(kb, (d_model,), dtype=jnp.float32) * 0.02
    gamma = jnp.ones((d_model,), dtype=jnp.float32)   # LayerNorm weight init
    beta = jnp.zeros((d_model,), dtype=jnp.float32)   # LayerNorm bias init

    # Case 1: standard small shape (rows divisible by the sublane multiple).
    x = jax.random.normal(kx, (2, 8, d_model), dtype=jnp.float32)
    out = sublayer_forward(x, w, b, gamma, beta)
    jax.block_until_ready(out)
    ref = _reference(x, w, b, gamma, beta)
    assert out.shape == x.shape
    assert jnp.allclose(out, ref, atol=1e-4, rtol=1e-4), "mismatch vs reference (case 1)"

    # Case 2: row count not a multiple of the tile -> ragged last block (masked stores),
    # no host-side padding or slicing.
    x_odd = jax.random.normal(kx2, (3, 5, d_model), dtype=jnp.float32)
    out_odd = sublayer_forward(x_odd, w, b, gamma, beta)
    jax.block_until_ready(out_odd)
    ref_odd = _reference(x_odd, w, b, gamma, beta)
    assert jnp.allclose(out_odd, ref_odd, atol=1e-4, rtol=1e-4), "mismatch vs reference (case 2)"

    # Case 3: opt-in bf16 MXU feeding (f32 accumulation, f32 LN math) -> looser tolerance.
    out_bf16 = sublayer_forward(x, w, b, gamma, beta, mxu_bf16=True)
    jax.block_until_ready(out_bf16)
    assert jnp.allclose(out_bf16, ref, atol=5e-2, rtol=5e-2), "mismatch vs reference (case 3)"

    print("KERNEL_OK")
</pallas_src>

<mosaic_0001>
module attributes {stable_mosaic.version = 11 : i64} {
  func.func @sublayer_kernel(%arg0: i32, %arg1: memref<8x128xf32, #tpu.memory_space<vmem>>, %arg2: memref<128x128xf32, #tpu.memory_space<vmem>>, %arg3: memref<3x128xf32, #tpu.memory_space<vmem>>, %arg4: memref<8x128xf32, #tpu.memory_space<vmem>>) attributes {dimension_semantics = [#tpu.dimension_semantics<parallel>], iteration_bounds = array<i64: 2>, scalar_prefetch = 0 : i64, scratch_operands = 0 : i64, tpu.core_type = #tpu.core_type<tc>, window_params = [{transform_indices = @transform_0, window_bounds = array<i64: 8, 128>}, {pipeline_mode = #tpu.pipeline_mode<synchronous>, transform_indices = @transform_1, window_bounds = array<i64: 128, 128>}, {pipeline_mode = #tpu.pipeline_mode<synchronous>, transform_indices = @transform_2, window_bounds = array<i64: 3, 128>}, {transform_indices = @transform_3, window_bounds = array<i64: 8, 128>}]} {
    %c0 = arith.constant 0 : index
    %c0_0 = arith.constant 0 : index
    %0 = vector.load %arg1[%c0, %c0_0] : memref<8x128xf32, #tpu.memory_space<vmem>>, vector<8x128xf32>
    %c0_1 = arith.constant 0 : index
    %c0_2 = arith.constant 0 : index
    %1 = vector.load %arg2[%c0_1, %c0_2] : memref<128x128xf32, #tpu.memory_space<vmem>>, vector<128x128xf32>
    %cst = arith.constant dense<0.000000e+00> : vector<8x128xf32>
    %2 = tpu.matmul %0, %1, %cst {dimension_numbers = #tpu.dot_dimension_numbers<[1], [0], [0], [1], [0, 0, 1, 1], [], []>} : vector<8x128xf32>, vector<128x128xf32>, vector<8x128xf32> -> vector<8x128xf32>
    %c0_3 = arith.constant 0 : index
    %c0_4 = arith.constant 0 : index
    %3 = vector.load %arg3[%c0_3, %c0_4] : memref<3x128xf32, #tpu.memory_space<vmem>>, vector<1x128xf32>
    %c1 = arith.constant 1 : index
    %c0_5 = arith.constant 0 : index
    %4 = vector.load %arg3[%c1, %c0_5] : memref<3x128xf32, #tpu.memory_space<vmem>>, vector<1x128xf32>
    %c2 = arith.constant 2 : index
    %c0_6 = arith.constant 0 : index
    %5 = vector.load %arg3[%c2, %c0_6] : memref<3x128xf32, #tpu.memory_space<vmem>>, vector<1x128xf32>
    %6 = arith.addf %0, %2 : vector<8x128xf32>
    %7 = vector.broadcast %3 : vector<1x128xf32> to vector<8x128xf32>
    %8 = arith.addf %6, %7 : vector<8x128xf32>
    %cst_7 = arith.constant dense<0.000000e+00> : vector<8xf32>
    %9 = vector.multi_reduction <add>, %8, %cst_7 [1] : vector<8x128xf32> to vector<8xf32>
    %10 = vector.shape_cast %9 : vector<8xf32> to vector<8x1xf32>
    %cst_8 = arith.constant 7.812500e-03 : f32
    %11 = vector.broadcast %cst_8 : f32 to vector<8x1xf32>
    %12 = arith.mulf %10, %11 : vector<8x1xf32>
    %13 = vector.broadcast %12 : vector<8x1xf32> to vector<8x128xf32>
    %14 = arith.subf %8, %13 : vector<8x128xf32>
    %15 = arith.mulf %14, %14 : vector<8x128xf32>
    %cst_9 = arith.constant dense<0.000000e+00> : vector<8xf32>
    %16 = vector.multi_reduction <add>, %15, %cst_9 [1] : vector<8x128xf32> to vector<8xf32>
    %17 = vector.shape_cast %16 : vector<8xf32> to vector<8x1xf32>
    %cst_10 = arith.constant 7.812500e-03 : f32
    %18 = vector.broadcast %cst_10 : f32 to vector<8x1xf32>
    %19 = arith.mulf %17, %18 : vector<8x1xf32>
    %cst_11 = arith.constant 9.99999974E-6 : f32
    %20 = vector.broadcast %cst_11 : f32 to vector<8x1xf32>
    %21 = arith.addf %19, %20 : vector<8x1xf32>
    %22 = math.rsqrt %21 : vector<8x1xf32>
    %23 = vector.broadcast %22 : vector<8x1xf32> to vector<8x128xf32>
    %24 = arith.mulf %14, %23 : vector<8x128xf32>
    %25 = vector.broadcast %4 : vector<1x128xf32> to vector<8x128xf32>
    %26 = arith.mulf %24, %25 : vector<8x128xf32>
    %27 = vector.broadcast %5 : vector<1x128xf32> to vector<8x128xf32>
    %28 = arith.addf %26, %27 : vector<8x128xf32>
    %c0_12 = arith.constant 0 : index
    %c0_13 = arith.constant 0 : index
    %29 = vector.load %arg4[%c0_12, %c0_13] : memref<8x128xf32, #tpu.memory_space<vmem>>, vector<8x128xf32>
    tpu.vector_store %arg4[%c0_12, %c0_13], %28 {strides = array<i32>} : memref<8x128xf32, #tpu.memory_space<vmem>>, vector<8x128xf32>,
    return
  }
  func.func @transform_0(%arg0: i32) -> (i32, i32) {
    %c0_i32 = arith.constant 0 : i32
    %c0_i32_0 = arith.constant 0 : i32
    return %arg0, %c0_i32 : i32, i32
  }
  func.func @transform_1(%arg0: i32) -> (i32, i32) {
    %c0_i32 = arith.constant 0 : i32
    %c0_i32_0 = arith.constant 0 : i32
    %c0_i32_1 = arith.constant 0 : i32
    return %c0_i32, %c0_i32_0 : i32, i32
  }
  func.func @transform_2(%arg0: i32) -> (i32, i32) {
    %c0_i32 = arith.constant 0 : i32
    %c0_i32_0 = arith.constant 0 : i32
    %c0_i32_1 = arith.constant 0 : i32
    return %c0_i32, %c0_i32_0 : i32, i32
  }
  func.func @transform_3(%arg0: i32) -> (i32, i32) {
    %c0_i32 = arith.constant 0 : i32
    %c0_i32_0 = arith.constant 0 : i32
    return %arg0, %c0_i32 : i32, i32
  }
}

</mosaic_0001>

<bundles_post_ra>
// kernel: tpu_custom_call.1
= control target key start
LH: loop header
LB: loop body
LE: loop exit
PB: predicated region body
PF: predicated region fallthrough
CT: control target
= control target key end

     0   :  { %8 = vsyncpa [#allocation3], 0  ;;  %s940_s0 = inlined_call_operand.hbm [shape: f32[16,128], index: 0, kind: input, shape index: {}]   ;;  %s941_s1 = inlined_call_operand.hbm [shape: f32[128,128], index: 1, kind: input, shape index: {}]   ;;  %s942_s2 = inlined_call_operand.vmem [shape: f32[3,128], index: 2, kind: input, shape index: {}]   ;;  %s943_s3 = inlined_call_operand.hbm [shape: f32[16,128], index: 3, kind: output, shape index: {}]  }
   0x1   :  { %10 = vsyncpa [#allocation3 + $0x1], 0 }
   0x2   :  { %11 = vsyncpa [#allocation6], 0 }
   0x3   :  { %12 = vsyncpa [#allocation4], 0 }
   0x4   :  { %14 = vsyncpa [#allocation4 + $0x1], 0  ;;  %s728_s12 = smov 0   ;;  %s730_s13 = smov 0  }
   0x5   :  { %s732_s14 = smov 0   ;;  %s734_s15 = smov 0  }
   0x6 LB: > { %s749_s16 = sadd.s32 4294967295, %s698_s15   ;;  %s413_s17 = sadd.s32 4294967294, %s698_s15   ;;  %s698_s15 = sphi %s734_s15, %s963_s15   ;;  %s694_s14 = sphi %s732_s14, %s962_s14   ;;  %s690_s13 = sphi %s730_s13, %s961_s13   ;;  %s686_s12 = sphi %s728_s12, %s960_s12  }
   0x7   : > { %p40_p0 = scmp.ne.s32.totalorder %s690_s13, %s686_s12  ;;  %p944_p1 = scmp.eq.s32.totalorder %s749_s16, 0 }
   0x8   : > { %p112_p3 = scmp.eq.s32.totalorder %s413_s17, 1  ;;  %p414_p5 = scmp.ge.s32.totalorder %s698_s15, 1 }
   0x9   : > { %p758_p4 = por %p944_p1, %p40_p0  ;;  %p119_p7 = scmp.lt.s32.totalorder %s698_s15, 3 }
   0xa   : > { %p763_p6 = por %p112_p3, %p40_p0  ;;  %s700_s21 = smov [#allocation5]  }
   0xb   : > { %s947_s18 = scalar_select %p758_p4, 1, 0 }
   0xc   : > { %s948_s19 = scalar_select %p763_p6, 1, 0 }
   0xd   : > { %p768_p8 = pnand %p414_p5, %p119_p7  ;;  %s131_s22 = sshll.u32 %s700_s21, 4  ;;  %s772_s22 = int_to_ptr.vmem [resolvable:$true] %s131_s22 }
   0xe   : > { %s784_s24 = sadd.s32 1, %s698_s15   ;;  %s27_s25 = sadd.s32 1, %s694_s14 }
   0xf   : > { %s949_s20 = scalar_select %p768_p8, 1, 0 }
  0x10   : > { %p514_p9 = pneg %p768_p8  ;;  %s24_s26 = ssub.s32 %s698_s15, %s784_s24 }
  0x11   : > { %s570_s29 = scalar_lea.hbm %s941_s1, 2048 }
  0x12   : > { %p779_p11 = pnand %p514_p9, %p944_p1  ;;  %p571_p12 = scmp.ne.s32.totalorder %s941_s1, %s570_s29 }
  0x13   : > { %p577_p5 = scmp.lt.u32.totalorder %s570_s29, %s941_s1 }
  0x14   : > { %p572_p13 = pneg %p779_p11 }
  0x16   : > { %p573_p0 = pnand %p572_p13, %p571_p12 }
  0x18   : > { %p574_p3 = pneg %p573_p0 }
  0x1a   : > { %p579_p7 = pnand %p577_p5, %p574_p3 }
  0x1c   : > { %582 = shalt.err (!%p579_p7)
}
  0x1d   : > { %s583_s7 = scalar_lea.vmem %s772_s22, 2048  ;;  %p591_p2 = scmp.lt.s32.totalorder %s772_s22, %s772_s22 }
  0x1e   : > { %p584_p9 = scmp.ne.s32.totalorder %s772_s22, %s583_s7  ;;  %p592_p6 = scmp.lt.s32.totalorder %s583_s7, %s583_s7 }
  0x20   : > { %p586_p10 = pnand %p584_p9, %p572_p13  ;;  %p593_p4 = por %p592_p6, %p591_p2 }
  0x22   : > { %p587_p1 = pneg %p586_p10 }
  0x24   : > { %p594_p8 = pnand %p593_p4, %p587_p1 }
  0x26   : > { %597 = shalt.err (!%p594_p8)
}
  0x27   : > { %s701_s8 = smov 128   ;;  %s702_s9 = smov 8  }
  0x28   : > { %517 = dma.hbm_to_vmem [thread:$0]  (!%p779_p11), %s941_s1, 2048, %s772_s22, [#allocation6], %s701_s8, %s701_s8, %s702_s9  }
  0x29   : > { %p25_p2 = scmp.eq.s32.totalorder %s24_s26, 0  ;;  %p34_p1 = scmp.ne.s32.totalorder %s694_s14, %s690_s13 }
  0x2a   : > { %p35_p4 = scmp.eq.s32.totalorder %s698_s15, 0  ;;  %p527_p6 = scmp.lt.s32.totalorder %s698_s15, 2 }
  0x2b   : > { %s815_s17 = scalar_select %p25_p2, %s694_s14, %s27_s25  }
  0x2c   : > { %p36_p8 = por %p35_p4, %p34_p1  ;;  %p951_p10 = scmp.eq.s32.totalorder %s749_s16, 1 }
  0x2d   : > { %s148_s27 = sand.u32 1, %s694_s14   ;;  %s418_s28 = sshll.u32 %s698_s15, 7 }
  0x2e   : > { %p819_p12 = por %p951_p10, %p34_p1  ;;  %s417_s29 = sshll.u32 %s148_s27, 3 }
  0x2f   : > { %s828_s4 = scalar_lea.hbm %s940_s0, %s418_s28  ;;  %s152_s22 = scalar_lea.vmem [#allocation2], %s417_s29 }
  0x30   : > { %s159_s25 = sshll.u32 %s152_s22, 4  ;;  %p830_p11 = pnand %p527_p6, %p36_p8  ;;  %s834_s25 = int_to_ptr.vmem [resolvable:$true] %s159_s25 }
  0x31   : > { %s149_s5 = scalar_lea.sflag [#allocation3], %s148_s27  ;;  %s598_s6 = scalar_lea.hbm %s828_s4, 128 }
  0x32   : > { %p599_p13 = scmp.ne.s32.totalorder %s828_s4, %s598_s6  ;;  %p600_p0 = pneg %p830_p11 }
  0x33   : > { %s603_s9 = scalar_lea.hbm %s940_s0, 256  ;;  %p604_p7 = scmp.lt.u32.totalorder %s828_s4, %s940_s0 }
  0x34   : > { %p601_p3 = pnand %p600_p0, %p599_p13  ;;  %p605_p9 = scmp.lt.u32.totalorder %s603_s9, %s598_s6 }
  0x35   : > { %p607_p1 = scmp.lt.u32.totalorder %s598_s6, %s828_s4 }
  0x36   : > { %p602_p5 = pneg %p601_p3  ;;  %p606_p2 = por %p605_p9, %p604_p7 }
  0x38   : > { %p608_p4 = por %p607_p1, %p606_p2 }
  0x3a   : > { %p609_p6 = pnand %p608_p4, %p602_p5 }
  0x3c   : > { %612 = shalt.err (!%p609_p6)
}
  0x3d   : > { %s613_s27 = scalar_lea.vmem %s834_s25, 128  ;;  %s703_s28 = smov [#allocation2]  }
  0x3e   : > { %p614_p8 = scmp.ne.s32.totalorder %s834_s25, %s613_s27  ;;  %s618_s29 = sshll.u32 %s703_s28, 4  ;;  %s619_s29 = int_to_ptr.vmem [resolvable:$false] %s618_s29 }
  0x3f   : > { %s620_s23 = scalar_lea.vmem %s619_s29, 256  ;;  %p621_p3 = scmp.lt.s32.totalorder %s834_s25, %s619_s29 }
  0x40   : > { %p616_p10 = pnand %p614_p8, %p600_p0  ;;  %p622_p7 = scmp.lt.s32.totalorder %s620_s23, %s613_s27 }
  0x42   : > { %p617_p13 = pneg %p616_p10  ;;  %p623_p9 = por %p622_p7, %p621_p3 }
  0x44   : > { %p624_p2 = pnand %p623_p9, %p617_p13 }
  0x46   : > { %627 = shalt.err (!%p624_p2)
}
  0x47   : > { %521 = dma.hbm_to_vmem [thread:$0]  (!%p830_p11), %s828_s4, 128, %s834_s25, %s149_s5  }
  0x48   : > { %p954_p5 = scmp.ne.s32.totalorder %s949_s20, 0 }
  0x49   : > { %s864_s30 = sand.u32 (!%p954_p5), 1, %s690_s13   ;;  %p955_p0 = scmp.ne.s32.totalorder (!%p954_p5), %s947_s18, 0 }
  0x4a   : > { %168 = sbr.rel (%p954_p5) target bundleno = 660 (0x294), region = 32  ;;  %s420_s22 = sshll.u32 (!%p954_p5), %s864_s30, 3 }
  0x4b   : > { %s171_s6 = scalar_lea.sflag (!%p954_p5), [#allocation3], %s864_s30  ;;  %s870_s7 = scalar_lea.vmem (!%p954_p5), [#allocation2], %s420_s22 }
  0x51   : > { %673 = dma.done.wait (%p955_p0), %s171_s6, 128  }
  0x52   : > { %675 = vsyncadd (%p955_p0), %s171_s6, 4294967168  ;;  %p956_p11 = scmp.eq.s32.totalorder %s749_s16, 0 }
  0x54   : > { %677 = dma.done.wait (%p956_p11), [#allocation6], 2048   ;;  %p957_p1 = pmov %p956_p11 }
  0x55   : > { %v704_v0 = vmov 0.0|0.0   ;;  %vm705_vm0 = vmmov 0   ;;  %v706_v1 = vmov 0.0   ;;  %v202_v2 = vld [vmem:[#allocation5] sm:$0xff]  ;;  %v203_v3 = vld [vmem:[#allocation5 + $0x8] sm:$0xff]  ;;  %v204_v4 = vld [vmem:[#allocation5 + $0x10] sm:$0xff] }
  0x56   : > { %679 = vsyncadd (%p957_p1), [#allocation6], 4294965248  ;;  %482 = vmatprep.subr.bf16.mxu0 %v704_v0  ;;  %479 = vmatprep.mubr.msk.f32.mxu0 %vm705_vm0, %v706_v1  ;;  %v483_v5 = vpack.c.bf16 %v203_v3, %v202_v2  ;;  %v205_v6 = vld [vmem:[#allocation5 + $0x18] sm:$0xff]  ;;  %v206_v8 = vld [vmem:[#allocation5 + $0x20] sm:$0xff]  ;;  %s427_s8 = sshll.u32 %s749_s16, 7  ;;  %s200_s9 = scalar_lea.vmem [#allocation7], %s420_s22 }
  0x57   : > { %v486_v7 = vpack.c.bf16 %v205_v6, %v204_v4  ;;  %v207_v9 = vld [vmem:[#allocation5 + $0x28] sm:$0xff]  ;;  %v208_v11 = vld [vmem:[#allocation5 + $0x30] sm:$0xff]  ;;  %v209_v12 = vld [vmem:[#allocation5 + $0x38] sm:$0xff]  ;;  %s333_s10 = sshll.u32 %s200_s9, 4  ;;  %s896_s28 = scalar_lea.hbm %s943_s3, %s427_s8  ;;  %s898_s10 = int_to_ptr.vmem [resolvable:$true] %s333_s10 }
  0x58   : > { %484 = vmatpush3.bf16.msra.mxu0 %v483_v5  ;;  %v489_v10 = vpack.c.bf16 %v207_v9, %v206_v8  ;;  %v492_v13 = vpack.c.bf16 %v209_v12, %v208_v11  ;;  %v210_v14 = vld [vmem:[#allocation5 + $0x40] sm:$0xff]  ;;  %v211_v15 = vld [vmem:[#allocation5 + $0x48] sm:$0xff]  ;;  %v212_v17 = vld [vmem:[#allocation5 + $0x50] sm:$0xff]  ;;  %s320_s29 = scalar_lea.sflag [#allocation4], %s864_s30  ;;  %s628_s23 = scalar_lea.vmem %s898_s10, 128 }
  0x59   : > { %485 = vmatprep.subr.bf16.mxu0 %v704_v0  ;;  %v495_v16 = vpack.c.bf16 %v211_v15, %v210_v14  ;;  %v213_v18 = vld [vmem:[#allocation5 + $0x58] sm:$0xff]  ;;  %v214_v20 = vld [vmem:[#allocation5 + $0x60] sm:$0xff]  ;;  %v215_v21 = vld [vmem:[#allocation5 + $0x68] sm:$0xff]  ;;  %p629_p4 = scmp.ne.s32.totalorder %s898_s10, %s628_s23  ;;  %s707_s16 = smov [#allocation7]  }
  0x5a   : > { %v498_v19 = vpack.c.bf16 %v213_v18, %v212_v17  ;;  %v501_v22 = vpack.c.bf16 %v215_v21, %v214_v20  ;;  %v216_v23 = vld [vmem:[#allocation5 + $0x70] sm:$0xff]  ;;  %v217_v24 = vld [vmem:[#allocation5 + $0x78] sm:$0xff]  ;;  %s632_s22 = sshll.u32 %s707_s16, 4  ;;  %s633_s22 = int_to_ptr.vmem [resolvable:$false] %s632_s22 }
  0x5b   : > { %v504_v25 = vpack.c.bf16 %v217_v24, %v216_v23  ;;  %v201_v26 = vld [vmem:[%s870_s7] sm:$0xff]  ;;  %p630_p6 = pnand %p629_p4, %p819_p12  ;;  %s634_s6 = scalar_lea.vmem %s633_s22, 256 }
  0x5c   : > { %487 = vmatpush3.bf16.msra.mxu0 %v486_v7  ;;  %v423_v28 = vld [vmem:[%s942_s2] ss:$0 sm:$0xff]  ;;  %v424_v40 = vld [vmem:[%s942_s2 + $0x1] ss:$0 sm:$0xff]  ;;  %v425_v42 = vld [vmem:[%s942_s2 + $0x2] ss:$0 sm:$0xff]  ;;  %p635_p10 = scmp.lt.s32.totalorder %s898_s10, %s633_s22  ;;  %p636_p13 = scmp.lt.s32.totalorder %s634_s6, %s628_s23 }
  0x5d   : > { %488 = vmatprep.subr.bf16.mxu0 %v704_v0  ;;  %p631_p8 = pneg %p630_p6 }
  0x5e   : > { %p637_p3 = por %p636_p13, %p635_p10 }
  0x60   : > { %490 = vmatpush3.bf16.msra.mxu0 %v489_v10  ;;  %p638_p7 = pnand %p637_p3, %p631_p8 }
  0x61   : > { %491 = vmatprep.subr.bf16.mxu0 %v704_v0 }
  0x64   : > { %493 = vmatpush3.bf16.msra.mxu0 %v492_v13 }
  0x65   : > { %494 = vmatprep.subr.bf16.mxu0 %v704_v0 }
  0x68   : > { %496 = vmatpush3.bf16.msra.mxu0 %v495_v16 }
  0x69   : > { %497 = vmatprep.subr.bf16.mxu0 %v704_v0 }
  0x6c   : > { %499 = vmatpush3.bf16.msra.mxu0 %v498_v19 }
  0x6d   : > { %500 = vmatprep.subr.bf16.mxu0 %v704_v0 }
  0x70   : > { %502 = vmatpush3.bf16.msra.mxu0 %v501_v22 }
  0x71   : > { %503 = vmatprep.subr.bf16.mxu0 %v704_v0 }
  0x74   : > { %505 = vmatpush3.bf16.msra.mxu0 %v504_v25 }
  0x77   : > { %480 = vmatmul.mubr.f32.vlgmr.msra.gmra.mrb[0].mxu0 %v201_v26 }
 0x14a   : > { %v284_v27 = vpop.f32.mrb[0].mxu0 }
 0x14b   : > { %v291_v29 = vadd.f32 %v284_v27, %v201_v26  ;;  %v481_v30 = vpop.f32.mrb[1].mxu0 }
 0x14d   : > { %v296_v31 = vadd.f32 %v423_v28, %v291_v29 }
 0x14f   : > { %297 = vadd.xlane.f32.xlu0 %v296_v31 }
 0x1dc   : > { %v298_v32 = vpop.xlane.xlu0 %297 }
 0x1dd   : > { %v299_v33 = vmul.f32 0.0078125, %v298_v32 }
 0x1df   : > { %v300_v34 = vsub.f32 %v296_v31, %v299_v33 }
 0x1e1   : > { %v301_v35 = vmul.f32 %v300_v34, %v300_v34 }
 0x1e3   : > { %302 = vadd.xlane.f32.xlu0 %v301_v35 }
 0x270   : > { %v303_v36 = vpop.xlane.xlu0 %302 }
 0x271   : > { %v304_v37 = vmul.f32 0.0078125, %v303_v36 }
 0x273   : > { %v305_v38 = vadd.f32 1e-05, %v304_v37 }
 0x275   : > { %568 = vrsqrt.f32 %v305_v38 }
 0x27f   : > { %v569_v39 = vpop.eup %568 }
 0x280   : > { %v307_v41 = vmul.f32 %v569_v39, %v300_v34 }
 0x282   : > { %v312_v43 = vmul.f32 %v424_v40, %v307_v41 }
 0x284   : > { %v317_v44 = vadd.f32 %v425_v42, %v312_v43 }
 0x286   : > { %318 = vst [vmem:[%s200_s9] sm:$0xff] %v317_v44 }
 0x287   : > { %641 = shalt.err (!%p638_p7)
}
 0x288   : > { %s642_s30 = scalar_lea.hbm %s896_s28, 128  ;;  %s646_s20 = scalar_lea.hbm %s943_s3, 256 }
 0x289   : > { %p643_p9 = scmp.ne.s32.totalorder %s896_s28, %s642_s30  ;;  %p647_p0 = scmp.lt.u32.totalorder %s896_s28, %s943_s3 }
 0x28a   : > { %p648_p11 = scmp.lt.u32.totalorder %s646_s20, %s642_s30  ;;  %p650_p4 = scmp.lt.u32.totalorder %s642_s30, %s896_s28 }
 0x28b   : > { %p644_p2 = pnand %p643_p9, %p819_p12 }
 0x28c   : > { %p649_p1 = por %p648_p11, %p647_p0 }
 0x28d   : > { %p645_p5 = pneg %p644_p2 }
 0x28e   : > { %p651_p6 = por %p650_p4, %p649_p1 }
 0x290   : > { %p652_p8 = pnand %p651_p6, %p645_p5 }
 0x292   : > { %655 = shalt.err (!%p652_p8)
}
 0x293   : > { %512 = dma.vmem_to_hbm [thread:$0]  (%p819_p12), %s898_s10, 128, %s896_s28, %s320_s29  }
 0x294 PF: > { %s345_s26 = sand.u32 1, %s686_s12   ;;  %p958_p10 = scmp.ne.s32.totalorder %s948_s19, 0 }
 0x295   : > { %p959_p13 = scmp.ge.s32.totalorder %s698_s15, 2  ;;  %s346_s5 = scalar_lea.sflag [#allocation4], %s345_s26 }
 0x297   : > { %p523_p3 = pnand %p959_p13, %p958_p10 }
 0x299   : > { %681 = dma.done.wait (!%p523_p3), %s346_s5, 128  }
 0x29a   : > { %683 = vsyncadd (!%p523_p3), %s346_s5, 4294967168  ;;  %p17_p7 = scmp.ge.s32.totalorder %s784_s24, 4   ;;  %s960_s12 = smov %s690_s13 }
 0x29b   : > { %s961_s13 = smov %s694_s14  ;;  %s962_s14 = smov %s815_s17 }
 0x29c   : > { %s963_s15 = smov %s784_s24  ;;  %19 = sbr.rel (!%p17_p7) target bundleno = 6 (0x6), region = 81 }
 0x2a3   :  { %351 = vsyncpa [#allocation3], 1 }
 0x2a4   :  { %353 = vsyncpa [#allocation3 + $0x1], 1 }
 0x2a5   :  { %354 = vsyncpa [#allocation6], 1 }
 0x2a6   :  { %355 = vsyncpa [#allocation4], 1 }
 0x2a7   :  { %357 = vsyncpa [#allocation4 + $0x1], 1 }

</bundles_post_ra>
